<compile_context>
chip_gen: v5e
topology: v5e:2x2
jax: 0.10.0
libtpu: 0.0.40
codegen_flags: <defaults>
</compile_context>

<pallas_src>
import functools

import jax
import jax.numpy as jnp
from jax import lax
from jax.experimental import pallas as pl
from jax.experimental.pallas import tpu as pltpu


_MASK_VALUE = -1e30           # finite "minus infinity" for padded KV columns
_LOG2_E = 1.4426950408889634  # log2(e): exp(x) == exp2(x * log2(e))


def _flash_attend_kernel(q_ref, k_ref, v_ref, o_ref,
                         qs_sc, m_sc, l_sc, acc_sc, *,
                         scale_log2e, valid_in_last, num_kv, compute_dtype):
    # q_ref: (1, tq, D)  k_ref/v_ref: (1, tk, D)  o_ref: (1, tq, D)
    # qs_sc: (tq, D) compute_dtype (pre-scaled q)
    # m_sc/l_sc: (tq, 1) f32   acc_sc: (tq, D) f32
    kv = pl.program_id(2)

    @pl.when(kv == 0)
    def _init():
        # q is block-resident across the kv axis: scale it ONCE per q-tile.
        # The softmax scale is pre-multiplied by log2(e) so the online softmax
        # can use exp2 directly (no per-step O(tq*tk) log2(e) multiply).
        qs_sc[...] = (q_ref[0] *
                      jnp.asarray(scale_log2e, q_ref.dtype)).astype(compute_dtype)
        m_sc[...] = jnp.full_like(m_sc, -jnp.inf)
        l_sc[...] = jnp.zeros_like(l_sc)
        acc_sc[...] = jnp.zeros_like(acc_sc)

    q = qs_sc[...]                                   # (tq, D), pre-scaled
    k = k_ref[0].astype(compute_dtype)               # (tk, D)

    # Contract last dims directly on the MXU (no explicit k.T), f32 accumulate.
    s = lax.dot_general(q, k, dimension_numbers=(((1,), (1,)), ((), ())),
                        preferred_element_type=jnp.float32)   # (tq, tk) f32

    if valid_in_last is not None:
        # Only the final kv block contains padded columns: gate the masking so
        # the iota/compare/select runs once instead of on every kv step.
        def _mask(x):
            col = lax.broadcasted_iota(jnp.int32, x.shape, 1)
            return jnp.where(col < valid_in_last, x, _MASK_VALUE)

        s = lax.cond(kv == num_kv - 1, _mask, lambda x: x, s)

    # Online (base-2) softmax update.
    m_prev = m_sc[...]
    m_new = jnp.maximum(m_prev, jnp.max(s, axis=-1, keepdims=True))
    alpha = jnp.exp2(m_prev - m_new)                 # rescale of old stats
    p = jnp.exp2(s - m_new)                          # (tq, tk) f32

    l_sc[...] = alpha * l_sc[...] + jnp.sum(p, axis=-1, keepdims=True)
    acc_sc[...] = alpha * acc_sc[...] + jnp.dot(
        p.astype(compute_dtype), v_ref[0].astype(compute_dtype),
        preferred_element_type=jnp.float32)
    m_sc[...] = m_new

    @pl.when(kv == num_kv - 1)
    def _finalize():
        # Exact divide: this runs once per (b, q-tile), so an approximate
        # reciprocal saves nothing and only costs output precision.
        o_ref[0] = (acc_sc[...] / l_sc[...]).astype(o_ref.dtype)


def _round_up(x, m):
    return (x + m - 1) // m * m


def _divisor_block(n, target):
    """Largest b <= target with n % b == 0 and (b % 8 == 0 or b == n).

    Returns None if no such b exists."""
    if n <= target:
        return n
    b = (min(target, n) // 8) * 8
    while b >= 8:
        if n % b == 0:
            return b
        b -= 8
    return None


def _choose_seq_tiling(S, target):
    """Pick (block, padded_len) for the sequence axis, preferring no padding."""
    b = _divisor_block(S, target)
    if b is not None:
        return b, S
    # No multiple-of-8 divisor <= target: pad the sequence to a multiple of
    # 128 and tile with a block that divides the padded length.
    Sp = _round_up(S, 128)
    return _divisor_block(Sp, max(target, 128)), Sp


def attend(q, k, v, scale=None, *, block_q=None, block_k=None,
           use_bf16_matmul=False):
    """q, k, v: (B, H, S, D) arrays. Returns (B, H, S, D)."""
    assert q.shape == k.shape == v.shape
    B, H, S, D = q.shape
    if scale is None:
        scale = float(D) ** -0.5

    BH = B * H

    # ---- tile-size / padding selection -------------------------------------
    # 512x512 tiles amortize the per-grid-step overhead and keep VMEM tiny
    # (<2 MiB per buffer) on v5e/v6e/v7x.  (On v5e a slightly smaller q-tile
    # can help the single vector-store slot; sweep block_q/block_k if needed.)
    bq_target = block_q if block_q is not None else 512
    bk_target = block_k if block_k is not None else 512

    block_k_, Sp = _choose_seq_tiling(S, bk_target)
    block_q_ = _divisor_block(Sp, bq_target) or block_k_

    # v7x has 2 TensorCores: when B*H == 1, make sure the q axis has >= 2
    # steps so the ("parallel", "parallel", ...) grid can feed both cores.
    if BH == 1 and Sp // block_q_ < 2 and Sp >= 16:
        alt = _divisor_block(Sp, max(8, Sp // 2))
        if alt is not None:
            block_q_ = alt

    num_q = Sp // block_q_
    num_kv = Sp // block_k_

    # ---- wrapper-level padding (sequence axis only, only when needed) ------
    qf = q.reshape(BH, S, D)
    kf = k.reshape(BH, S, D)
    vf = v.reshape(BH, S, D)
    if Sp != S:
        pad = ((0, 0), (0, Sp - S), (0, 0))
        qf = jnp.pad(qf, pad)
        kf = jnp.pad(kf, pad)
        vf = jnp.pad(vf, pad)
        valid_in_last = S - (num_kv - 1) * block_k_   # valid cols in last block
    else:
        valid_in_last = None

    # ---- dtypes -------------------------------------------------------------
    if use_bf16_matmul and q.dtype == jnp.float32:
        compute_dtype = jnp.bfloat16     # feed bf16 to the MXU, accumulate f32
    else:
        compute_dtype = q.dtype

    kernel = functools.partial(
        _flash_attend_kernel,
        scale_log2e=float(scale) * _LOG2_E,
        valid_in_last=valid_in_last,
        num_kv=num_kv,
        compute_dtype=compute_dtype,
    )

    q_spec = pl.BlockSpec((1, block_q_, D), lambda b, i, j: (b, i, 0))
    kv_spec = pl.BlockSpec((1, block_k_, D), lambda b, i, j: (b, j, 0))
    o_spec = pl.BlockSpec((1, block_q_, D), lambda b, i, j: (b, i, 0))

    itemsize = jnp.dtype(q.dtype).itemsize
    comp_itemsize = jnp.dtype(compute_dtype).itemsize

    # Honest-ish HBM traffic: Q read once, K/V re-read num_q times, O written.
    cost = pl.CostEstimate(
        flops=4 * BH * Sp * Sp * D,
        transcendentals=BH * Sp * Sp,
        bytes_accessed=itemsize * BH * D * (Sp + 2 * Sp * num_q + Sp),
    )

    # Explicit scoped-VMEM budget (v5e default is only 16 MiB; v7x physical
    # VMEM is 64 MiB) with headroom for double buffering + internal scratch.
    vmem_bytes = (
        2 * block_q_ * D * itemsize          # q (double-buffered)
        + 2 * 2 * block_k_ * D * itemsize    # k, v (double-buffered)
        + 2 * block_q_ * D * itemsize        # out (double-buffered)
        + block_q_ * D * comp_itemsize       # scaled-q scratch
        + block_q_ * D * 4                   # f32 accumulator
        + 2 * block_q_ * 4                   # running max / denom
        + 2 * block_q_ * block_k_ * 4        # live f32 score / prob tiles
    )
    vmem_limit = int(min(max(2 * vmem_bytes, 16 * 1024 * 1024),
                         48 * 1024 * 1024))

    out = pl.pallas_call(
        kernel,
        out_shape=jax.ShapeDtypeStruct((BH, Sp, D), q.dtype),
        grid_spec=pltpu.PrefetchScalarGridSpec(
            num_scalar_prefetch=0,
            grid=(BH, num_q, num_kv),          # reduction (kv) axis last
            in_specs=[q_spec, kv_spec, kv_spec],
            out_specs=o_spec,
            scratch_shapes=[
                pltpu.VMEM((block_q_, D), compute_dtype),   # pre-scaled q
                pltpu.VMEM((block_q_, 1), jnp.float32),     # running max
                pltpu.VMEM((block_q_, 1), jnp.float32),     # running denom
                pltpu.VMEM((block_q_, D), jnp.float32),     # output accumulator
            ],
        ),
        compiler_params=pltpu.CompilerParams(
            dimension_semantics=("parallel", "parallel", "arbitrary"),
            vmem_limit_bytes=vmem_limit,
        ),
        cost_estimate=cost,
    )(qf, kf, vf)

    if Sp != S:
        out = out[:, :S, :]
    return out.reshape(B, H, S, D)


def _reference_attend(q, k, v, scale=None):
    D = q.shape[-1]
    if scale is None:
        scale = float(D) ** -0.5
    s = jnp.einsum("bhid,bhjd->bhij",
                   q.astype(jnp.float32), k.astype(jnp.float32)) * scale
    p = jax.nn.softmax(s, axis=-1)
    return jnp.einsum("bhij,bhjd->bhid", p, v.astype(jnp.float32)).astype(q.dtype)


if __name__ == "__main__":
    root_key = jax.random.PRNGKey(0)

    def _run_case(B, H, S, D, dtype=jnp.float32):
        kq, kk, kv_ = jax.random.split(jax.random.fold_in(root_key, S * 1000 + D), 3)
        q = jax.random.normal(kq, (B, H, S, D), dtype=dtype)
        k = jax.random.normal(kk, (B, H, S, D), dtype=dtype)
        v = jax.random.normal(kv_, (B, H, S, D), dtype=dtype)

        out = jax.block_until_ready(attend(q, k, v))
        ref = _reference_attend(q, k, v)

        assert out.shape == (B, H, S, D)
        assert jnp.allclose(out, ref, atol=2e-3, rtol=2e-3), (
            f"mismatch vs reference for shape {(B, H, S, D)}")

    # Small spec-consistent shape (single tile, no padding, D unpadded).
    _run_case(B=2, H=2, S=8, D=32)
    # Multi-block online softmax + seq-padding/masking path, D=64 unpadded.
    _run_case(B=1, H=2, S=516, D=64)

    print("KERNEL_OK")
</pallas_src>

<mosaic_0001>
module attributes {stable_mosaic.version = 11 : i64} {
  func.func @_flash_attend_kernel(%arg0: i32, %arg1: i32, %arg2: i32, %arg3: memref<1x8x32xf32, #tpu.memory_space<vmem>>, %arg4: memref<1x8x32xf32, #tpu.memory_space<vmem>>, %arg5: memref<1x8x32xf32, #tpu.memory_space<vmem>>, %arg6: memref<1x8x32xf32, #tpu.memory_space<vmem>>, %arg7: memref<8x32xf32, #tpu.memory_space<vmem>>, %arg8: memref<8x1xf32, #tpu.memory_space<vmem>>, %arg9: memref<8x1xf32, #tpu.memory_space<vmem>>, %arg10: memref<8x32xf32, #tpu.memory_space<vmem>>) attributes {dimension_semantics = [#tpu.dimension_semantics<parallel>, #tpu.dimension_semantics<parallel>, #tpu.dimension_semantics<arbitrary>], iteration_bounds = array<i64: 4, 1, 1>, scalar_prefetch = 0 : i64, scratch_operands = 4 : i64, tpu.core_type = #tpu.core_type<tc>, window_params = [{transform_indices = @transform_0, window_bounds = array<i64: 1, 8, 32>}, {transform_indices = @transform_1, window_bounds = array<i64: 1, 8, 32>}, {transform_indices = @transform_2, window_bounds = array<i64: 1, 8, 32>}, {transform_indices = @transform_3, window_bounds = array<i64: 1, 8, 32>}]} {
    %c0_i32 = arith.constant 0 : i32
    %0 = arith.cmpi eq, %arg2, %c0_i32 : i32
    %1 = arith.extui %0 : i1 to i32
    %c0_i32_0 = arith.constant 0 : i32
    %2 = arith.cmpi ne, %1, %c0_i32_0 : i32
    scf.if %2 {
      %c0_25 = arith.constant 0 : index
      %c0_26 = arith.constant 0 : index
      %c0_27 = arith.constant 0 : index
      %34 = vector.load %arg3[%c0_25, %c0_26, %c0_27] : memref<1x8x32xf32, #tpu.memory_space<vmem>>, vector<1x8x32xf32>
      %35 = vector.shape_cast %34 : vector<1x8x32xf32> to vector<8x32xf32>
      %cst_28 = arith.constant 0.255034864 : f32
      %36 = vector.broadcast %cst_28 : f32 to vector<8x32xf32>
      %37 = arith.mulf %35, %36 : vector<8x32xf32>
      %c0_29 = arith.constant 0 : index
      %c0_30 = arith.constant 0 : index
      %38 = vector.load %arg7[%c0_29, %c0_30] : memref<8x32xf32, #tpu.memory_space<vmem>>, vector<8x32xf32>
      tpu.vector_store %arg7[%c0_29, %c0_30], %37 {strides = array<i32>} : memref<8x32xf32, #tpu.memory_space<vmem>>, vector<8x32xf32>,
      %cst_31 = arith.constant 0xFF800000 : f32
      %39 = vector.broadcast %cst_31 : f32 to vector<8x1xf32>
      %c0_32 = arith.constant 0 : index
      %c0_33 = arith.constant 0 : index
      %40 = vector.load %arg8[%c0_32, %c0_33] : memref<8x1xf32, #tpu.memory_space<vmem>>, vector<8x1xf32>
      tpu.vector_store %arg8[%c0_32, %c0_33], %39 {strides = array<i32>} : memref<8x1xf32, #tpu.memory_space<vmem>>, vector<8x1xf32>,
      %cst_34 = arith.constant 0.000000e+00 : f32
      %41 = vector.broadcast %cst_34 : f32 to vector<8x1xf32>
      %c0_35 = arith.constant 0 : index
      %c0_36 = arith.constant 0 : index
      %42 = vector.load %arg9[%c0_35, %c0_36] : memref<8x1xf32, #tpu.memory_space<vmem>>, vector<8x1xf32>
      tpu.vector_store %arg9[%c0_35, %c0_36], %41 {strides = array<i32>} : memref<8x1xf32, #tpu.memory_space<vmem>>, vector<8x1xf32>,
      %cst_37 = arith.constant 0.000000e+00 : f32
      %43 = vector.broadcast %cst_37 : f32 to vector<8x32xf32>
      %c0_38 = arith.constant 0 : index
      %c0_39 = arith.constant 0 : index
      %44 = vector.load %arg10[%c0_38, %c0_39] : memref<8x32xf32, #tpu.memory_space<vmem>>, vector<8x32xf32>
      tpu.vector_store %arg10[%c0_38, %c0_39], %43 {strides = array<i32>} : memref<8x32xf32, #tpu.memory_space<vmem>>, vector<8x32xf32>,
    } else {
    }
    %c0 = arith.constant 0 : index
    %c0_1 = arith.constant 0 : index
    %3 = vector.load %arg7[%c0, %c0_1] : memref<8x32xf32, #tpu.memory_space<vmem>>, vector<8x32xf32>
    %c0_2 = arith.constant 0 : index
    %c0_3 = arith.constant 0 : index
    %c0_4 = arith.constant 0 : index
    %4 = vector.load %arg4[%c0_2, %c0_3, %c0_4] : memref<1x8x32xf32, #tpu.memory_space<vmem>>, vector<1x8x32xf32>
    %5 = vector.shape_cast %4 : vector<1x8x32xf32> to vector<8x32xf32>
    %cst = arith.constant dense<0.000000e+00> : vector<8x8xf32>
    %6 = tpu.matmul %3, %5, %cst {dimension_numbers = #tpu.dot_dimension_numbers<[1], [1], [0], [0], [0, 0, 1, 0], [], []>} : vector<8x32xf32>, vector<8x32xf32>, vector<8x8xf32> -> vector<8x8xf32>
    %c0_5 = arith.constant 0 : index
    %c0_6 = arith.constant 0 : index
    %7 = vector.load %arg8[%c0_5, %c0_6] : memref<8x1xf32, #tpu.memory_space<vmem>>, vector<8x1xf32>
    %cst_7 = arith.constant dense<0xFF800000> : vector<8xf32>
    %8 = vector.multi_reduction <maximumf>, %6, %cst_7 [1] : vector<8x8xf32> to vector<8xf32>
    %9 = vector.shape_cast %8 : vector<8xf32> to vector<8x1xf32>
    %10 = arith.maximumf %7, %9 : vector<8x1xf32>
    %11 = arith.subf %7, %10 : vector<8x1xf32>
    %12 = math.exp2 %11 : vector<8x1xf32>
    %13 = vector.broadcast %10 : vector<8x1xf32> to vector<8x8xf32>
    %14 = arith.subf %6, %13 : vector<8x8xf32>
    %15 = math.exp2 %14 : vector<8x8xf32>
    %c0_8 = arith.constant 0 : index
    %c0_9 = arith.constant 0 : index
    %16 = vector.load %arg9[%c0_8, %c0_9] : memref<8x1xf32, #tpu.memory_space<vmem>>, vector<8x1xf32>
    %17 = arith.mulf %12, %16 : vector<8x1xf32>
    %cst_10 = arith.constant dense<0.000000e+00> : vector<8xf32>
    %18 = vector.multi_reduction <add>, %15, %cst_10 [1] : vector<8x8xf32> to vector<8xf32>
    %19 = vector.shape_cast %18 : vector<8xf32> to vector<8x1xf32>
    %20 = arith.addf %17, %19 : vector<8x1xf32>
    %c0_11 = arith.constant 0 : index
    %c0_12 = arith.constant 0 : index
    %21 = vector.load %arg9[%c0_11, %c0_12] : memref<8x1xf32, #tpu.memory_space<vmem>>, vector<8x1xf32>
    tpu.vector_store %arg9[%c0_11, %c0_12], %20 {strides = array<i32>} : memref<8x1xf32, #tpu.memory_space<vmem>>, vector<8x1xf32>,
    %c0_13 = arith.constant 0 : index
    %c0_14 = arith.constant 0 : index
    %22 = vector.load %arg10[%c0_13, %c0_14] : memref<8x32xf32, #tpu.memory_space<vmem>>, vector<8x32xf32>
    %23 = vector.broadcast %12 : vector<8x1xf32> to vector<8x32xf32>
    %24 = arith.mulf %23, %22 : vector<8x32xf32>
    %c0_15 = arith.constant 0 : index
    %c0_16 = arith.constant 0 : index
    %c0_17 = arith.constant 0 : index
    %25 = vector.load %arg5[%c0_15, %c0_16, %c0_17] : memref<1x8x32xf32, #tpu.memory_space<vmem>>, vector<1x8x32xf32>
    %26 = vector.shape_cast %25 : vector<1x8x32xf32> to vector<8x32xf32>
    %cst_18 = arith.constant dense<0.000000e+00> : vector<8x32xf32>
    %27 = tpu.matmul %15, %26, %cst_18 {dimension_numbers = #tpu.dot_dimension_numbers<[1], [0], [0], [1], [0, 0, 1, 1], [], []>} : vector<8x8xf32>, vector<8x32xf32>, vector<8x32xf32> -> vector<8x32xf32>
    %28 = arith.addf %24, %27 : vector<8x32xf32>
    %c0_19 = arith.constant 0 : index
    %c0_20 = arith.constant 0 : index
    %29 = vector.load %arg10[%c0_19, %c0_20] : memref<8x32xf32, #tpu.memory_space<vmem>>, vector<8x32xf32>
    tpu.vector_store %arg10[%c0_19, %c0_20], %28 {strides = array<i32>} : memref<8x32xf32, #tpu.memory_space<vmem>>, vector<8x32xf32>,
    %c0_21 = arith.constant 0 : index
    %c0_22 = arith.constant 0 : index
    %30 = vector.load %arg8[%c0_21, %c0_22] : memref<8x1xf32, #tpu.memory_space<vmem>>, vector<8x1xf32>
    tpu.vector_store %arg8[%c0_21, %c0_22], %10 {strides = array<i32>} : memref<8x1xf32, #tpu.memory_space<vmem>>, vector<8x1xf32>,
    %c0_i32_23 = arith.constant 0 : i32
    %31 = arith.cmpi eq, %arg2, %c0_i32_23 : i32
    %32 = arith.extui %31 : i1 to i32
    %c0_i32_24 = arith.constant 0 : i32
    %33 = arith.cmpi ne, %32, %c0_i32_24 : i32
    scf.if %33 {
      %c0_25 = arith.constant 0 : index
      %c0_26 = arith.constant 0 : index
      %34 = vector.load %arg10[%c0_25, %c0_26] : memref<8x32xf32, #tpu.memory_space<vmem>>, vector<8x32xf32>
      %c0_27 = arith.constant 0 : index
      %c0_28 = arith.constant 0 : index
      %35 = vector.load %arg9[%c0_27, %c0_28] : memref<8x1xf32, #tpu.memory_space<vmem>>, vector<8x1xf32>
      %36 = vector.broadcast %35 : vector<8x1xf32> to vector<8x32xf32>
      %37 = arith.divf %34, %36 : vector<8x32xf32>
      %c0_29 = arith.constant 0 : index
      %c0_30 = arith.constant 0 : index
      %c0_31 = arith.constant 0 : index
      %38 = vector.load %arg6[%c0_29, %c0_30, %c0_31] : memref<1x8x32xf32, #tpu.memory_space<vmem>>, vector<1x8x32xf32>
      %39 = vector.shape_cast %38 : vector<1x8x32xf32> to vector<8x32xf32>
      %40 = vector.shape_cast %37 : vector<8x32xf32> to vector<1x8x32xf32>
      tpu.vector_store %arg6[%c0_29, %c0_30, %c0_31], %40 {strides = array<i32>} : memref<1x8x32xf32, #tpu.memory_space<vmem>>, vector<1x8x32xf32>,
    } else {
    }
    return
  }
  func.func @transform_0(%arg0: i32, %arg1: i32, %arg2: i32) -> (i32, i32, i32) {
    %c0_i32 = arith.constant 0 : i32
    %c0_i32_0 = arith.constant 0 : i32
    return %arg0, %arg1, %c0_i32 : i32, i32, i32
  }
  func.func @transform_1(%arg0: i32, %arg1: i32, %arg2: i32) -> (i32, i32, i32) {
    %c0_i32 = arith.constant 0 : i32
    %c0_i32_0 = arith.constant 0 : i32
    return %arg0, %arg2, %c0_i32 : i32, i32, i32
  }
  func.func @transform_2(%arg0: i32, %arg1: i32, %arg2: i32) -> (i32, i32, i32) {
    %c0_i32 = arith.constant 0 : i32
    %c0_i32_0 = arith.constant 0 : i32
    return %arg0, %arg2, %c0_i32 : i32, i32, i32
  }
  func.func @transform_3(%arg0: i32, %arg1: i32, %arg2: i32) -> (i32, i32, i32) {
    %c0_i32 = arith.constant 0 : i32
    %c0_i32_0 = arith.constant 0 : i32
    return %arg0, %arg1, %c0_i32 : i32, i32, i32
  }
}

</mosaic_0001>

<bundles_post_ra>
// kernel: tpu_custom_call.1
= control target key start
LH: loop header
LB: loop body
LE: loop exit
PB: predicated region body
PF: predicated region fallthrough
CT: control target
= control target key end

     0   :  { %s1038_s0 = inlined_call_operand.hbm [shape: f32[4,8,32], index: 0, kind: input, shape index: {}]   ;;  %s1039_s1 = inlined_call_operand.hbm [shape: f32[4,8,32], index: 1, kind: input, shape index: {}]   ;;  %s1040_s2 = inlined_call_operand.hbm [shape: f32[4,8,32], index: 2, kind: input, shape index: {}]   ;;  %s1041_s3 = inlined_call_operand.hbm [shape: f32[4,8,32], index: 3, kind: output, shape index: {}]  }
   0x1   :  { %1044 = sst [smem:[#allocation19_spill]] %s1039_s1 }
   0x2   :  { %8 = vsyncpa [#allocation7], 0 }
   0x3   :  { %10 = vsyncpa [#allocation7 + $0x1], 0 }
   0x4   :  { %11 = vsyncpa [#allocation10], 0 }
   0x5   :  { %13 = vsyncpa [#allocation10 + $0x1], 0 }
   0x6   :  { %14 = vsyncpa [#allocation8], 0 }
   0x7   :  { %16 = vsyncpa [#allocation8 + $0x1], 0  ;;  %s869_s12 = smov 0   ;;  %s871_s13 = smov 0  }
   0x8   :  { %s873_s14 = smov 0   ;;  %s875_s15 = smov 0  }
   0x9   :  { %s877_s16 = smov 0   ;;  %s879_s17 = smov 0  }
   0xa LB: > { %1045 = sst [smem:[#allocation16_spill]] %s840_s16  ;;  %s900_s18 = sadd.s32 4294967295, %s844_s17   ;;  %s844_s17 = sphi %s879_s17, %s22_s17   ;;  %s840_s16 = sphi %s877_s16, %s1057_s16   ;;  %s836_s15 = sphi %s875_s15, %s1056_s15   ;;  %s832_s14 = sphi %s873_s14, %s1060_s14   ;;  %s828_s13 = sphi %s871_s13, %s1059_s13   ;;  %s824_s12 = sphi %s869_s12, %s1058_s12  }
   0xb   : > { %s563_s19 = sadd.s32 4294967294, %s844_s17   ;;  %s41_s20 = sadd.s32 1, %s840_s16 }
   0xc   : > { %s50_s21 = sadd.s32 1, %s832_s14  ;;  %p43_p0 = scmp.ge.s32.totalorder %s41_s20, 4 }
   0xd   : > { %p57_p1 = scmp.ne.s32.totalorder %s832_s14, %s828_s13  ;;  %p58_p2 = scmp.eq.s32.totalorder %s844_s17, 0 }
   0xe   : > { %p63_p3 = scmp.ne.s32.totalorder %s828_s13, %s824_s12  ;;  %s1062_s20 = smov (%p43_p0, %s41_s20), 0 }
   0xf   : > { %1046 = sst [smem:[#allocation17_spill]] %s1062_s20  ;;  %p912_p4 = por %p58_p2, %p57_p1 }
  0x10   : > { %p64_p5 = scmp.eq.s32.totalorder %s900_s18, 0  ;;  %s45_s23 = ssub.s32 %s840_s16, %s1062_s20 }
  0x11   : > { %p145_p6 = scmp.eq.s32.totalorder %s900_s18, 3  ;;  %p48_p7 = scmp.eq.s32.totalorder %s45_s23, 0 }
  0x12   : > { %p920_p8 = por %p64_p5, %p63_p3  ;;  %p151_p10 = scmp.eq.s32.totalorder %s563_s19, 3 }
  0x13   : > { %p924_p9 = por %p145_p6, %p57_p1  ;;  %p606_p12 = scmp.lt.s32.totalorder %s844_s17, 4 }
  0x14   : > { %s929_s26 = scalar_select %p48_p7, %s832_s14, %s50_s21  }
  0x15   : > { %p931_p11 = por %p151_p10, %p63_p3  ;;  %s171_s28 = sand.u32 1, %s832_s14  }
  0x16   : > { %1050 = sst [smem:[#allocation18_spill]] %s929_s26  ;;  %s566_s29 = sshll.u32 %s171_s28, 3 }
  0x17   : > { %s567_s30 = sshll.u32 %s840_s16, 3  ;;  %p940_p13 = pnand %p606_p12, %p912_p4 }
  0x18   : > { %s191_s5 = sand.u32 1, %s844_s17   ;;  %s1053_s1 = sld [smem:[#allocation19_spill]] }
  0x19   : > { %s195_s10 = scalar_lea.vmem [#allocation9], %s566_s29  ;;  %s192_s19 = scalar_lea.sflag [#allocation10], %s191_s5 }
  0x1a   : > { %s204_s11 = sshll.u32 %s195_s10, 4  ;;  %p572_p0 = scmp.ge.s32.totalorder %s844_s17, 1  ;;  %s205_s11 = int_to_ptr.vmem [resolvable:$true] %s204_s11 }
  0x1b   : > { %p229_p1 = scmp.lt.s32.totalorder %s844_s17, 5  ;;  %s180_s6 = scalar_lea.hbm %s1038_s0, %s567_s30 }
  0x1c   : > { %s182_s7 = sshll.u32 %s180_s6, 4  ;;  %s172_s10 = scalar_lea.sflag [#allocation7], %s171_s28  ;;  %s183_s7 = int_to_ptr.hbm [resolvable:$true] %s182_s7 }
  0x1d   : > { %p952_p2 = pnand %p572_p0, %p229_p1  ;;  %s215_s16 = scalar_lea.vmem [#allocation11], %s566_s29 }
  0x1e   : > { %s200_s8 = scalar_lea.hbm %s1053_s1, %s567_s30  ;;  %s224_s26 = sshll.u32 %s215_s16, 4  ;;  %s225_s26 = int_to_ptr.vmem [resolvable:$true] %s224_s26 }
  0x1f   : > { %s202_s9 = sshll.u32 %s200_s8, 4  ;;  %s175_s8 = scalar_lea.vmem [#allocation6], %s566_s29  ;;  %s203_s9 = int_to_ptr.hbm [resolvable:$true] %s202_s9 }
  0x20   : > { %598 = dma.hbm_to_vmem [thread:$0]  (!%p940_p13), %s203_s9, 128, %s205_s11, %s192_s19  }
  0x21   : > { %s184_s1 = sshll.u32 %s175_s8, 4  ;;  %s220_s11 = scalar_lea.hbm %s1040_s2, %s567_s30  ;;  %s185_s1 = int_to_ptr.vmem [resolvable:$true] %s184_s1 }
  0x22   : > { %595 = dma.hbm_to_vmem [thread:$0]  (!%p940_p13), %s183_s7, 128, %s185_s1, %s172_s10  }
  0x23   : > { %s222_s20 = sshll.u32 %s220_s11, 4  ;;  %233 = sbr.rel (%p952_p2) target bundleno = 688 (0x2b0), region = 32  ;;  %s223_s20 = int_to_ptr.hbm [resolvable:$true] %s222_s20 }
  0x24   : > { %601 = dma.hbm_to_vmem [thread:$0]  (!%p940_p13), %s223_s20, 128, %s225_s26, %s192_s19  }
  0x25   : > { %s969_s22 = sand.u32 (!%p952_p2), 1, %s828_s13  }
  0x26   : > { %s972_s1 = sshll.u32 (!%p952_p2), %s969_s22, 3  ;;  %s236_s28 = scalar_lea.sflag (!%p952_p2), [#allocation7], %s969_s22 }
  0x27   : > { %s239_s30 = scalar_lea.vmem (!%p952_p2), [#allocation6], %s972_s1 }
  0x28   : > { %811 = dma.done.wait (%p920_p8), %s236_s28, 128  }
  0x29   : > { %813 = vsyncadd (%p920_p8), %s236_s28, 4294967168  ;;  %s245_s16 = sand.u32 1, %s900_s18   ;;  %s249_s26 = scalar_lea.vmem [#allocation9], %s972_s1 }
  0x2a   : > { %s246_s20 = scalar_lea.sflag [#allocation10], %s245_s16 }
  0x2b   : > { %815 = dma.done.wait (%p920_p8), %s246_s20, 256  }
  0x2c   : > { %817 = vsyncadd (%p920_p8), %s246_s20, 4294967040  ;;  %vm299_vm0 = vcmask 261120   ;;  %v846_v0 = vmov 0.0   ;;  %v297_v1 = vld [vmem:[%s239_s30] sm:$0xff]  ;;  %v306_v2 = vld [vmem:[%s249_s26] sm:$0xff]  ;;  %vm301_vm1 = vcmask 7168  }
  0x2d   : > { %304 = vst.msk [vmem:[#allocation5] sm:$0xff] %vm299_vm0, %v846_v0  ;;  %v298_v3 = vmul.f32 0.25503486, %v297_v1  ;;  %577 = vmatpush.xpose.msk.msra.mxu0 %vm299_vm0, %v306_v2  ;;  %v847_v5 = vmov -inf   ;;  %vm335_vm2 = vcmask 64512   ;;  %v848_v8 = vmov 0  }
  0x2e   : > { %302 = vst.msk [vmem:[#allocation3] sm:$0xff] %vm301_vm1, %v847_v5  ;;  %659 = vset.pattern.permute.xlu0 %v848_v8  ;;  %661 = vset.pattern.permute.xlu2 %v848_v8  ;;  %s259_s18 = scalar_lea.vmem [#allocation11], %s972_s1  ;;  %s581_s24 = sshll.u32 %s836_s15, 3 }
  0x2f   : > { %300 = vst.msk [vmem:[#allocation2] sm:$0xff] %vm299_vm0, %v298_v3  ;;  %660 = vset.pattern.permute.xlu1 %v848_v8  ;;  %v364_v14 = vld [vmem:[%s259_s18] sm:$0xff]  ;;  %s429_s19 = scalar_lea.hbm %s1041_s3, %s581_s24  ;;  %s292_s21 = scalar_lea.vmem [#allocation12], %s972_s1 }
  0x30   : > { %303 = vst.msk [vmem:[#allocation4] sm:$0xff] %vm301_vm1, %v846_v0  ;;  %383 = vmatpush.msra.mxu1 %v364_v14  ;;  %s431_s23 = sshll.u32 %s292_s21, 4  ;;  %s433_s6 = sshll.u32 %s429_s19, 4  ;;  %s432_s23 = int_to_ptr.vmem [resolvable:$true] %s431_s23  ;;  %s434_s6 = int_to_ptr.hbm [resolvable:$true] %s433_s6 }
  0x31   : > { %s418_s15 = scalar_lea.sflag [#allocation8], %s969_s22  ;;  %s772_s7 = sshra.s32 %s434_s6, 4  ;;  %s773_s7 = int_to_ptr.hbm [resolvable:$true] %s772_s7 }
  0x32   : > { %s774_s8 = scalar_lea.hbm %s773_s7, 8  ;;  %s778_s9 = scalar_lea.hbm %s1041_s3, 32 }
  0x33   : > { %p775_p3 = scmp.ne.s32.totalorder %s773_s7, %s774_s8  ;;  %p779_p6 = scmp.lt.s32.totalorder %s773_s7, %s1041_s3 }
  0x34   : > { %v357_v23 = vld [vmem:[#allocation5] sm:$0xff]  ;;  %p780_p7 = scmp.lt.s32.totalorder %s778_s9, %s774_s8 }
  0x35   : > { %v334_v9 = vld [vmem:[#allocation3] sm:$0xff]  ;;  %p776_p4 = pnand %p775_p3, %p924_p9 }
  0x36   : > { %v305_v4 = vld [vmem:[#allocation2] sm:$0xff]  ;;  %p781_p8 = por %p780_p7, %p779_p6 }
  0x37   : > { %578 = vmatmul.msk.f32.vlgmr.msra.gmra.mxu0 %vm299_vm0, %v305_v4  ;;  %v349_v19 = vld [vmem:[#allocation4] sm:$0xff]  ;;  %p777_p5 = pneg %p776_p4 }
  0x39   : > { %p782_p10 = pnand %p781_p8, %p777_p5 }
  0xb4   : > { %v331_v6 = vpop.f32.mrf.mxu0 }
  0xb5   : > { %v336_v7 = vsel %vm335_vm2, %v331_v6, -inf }
  0xb6   : > { %337 = vmax.xlane.f32.xlu0 %v336_v7 }
 0x129   : > { %v338_v10 = vpop.xlane.xlu0 %337 }
 0x12a   : > { %v339_v11 = vmax.f32 %v334_v9, %v338_v10 }
 0x12c   : > { %v340_v12 = vsub.f32 %v334_v9, %v339_v11  ;;  %390 = vst.msk [vmem:[#allocation3] sm:$0xff] %vm301_vm1, %v339_v11  ;;  %344 = vperm.xlu0 %659, %v339_v11  }
 0x12e   : > { %662 = vpow2.f32 %v340_v12 }
 0x134   : > { %v663_v13 = vpop.eup %662 }
 0x135   : > { %360 = vperm.xlu2 %661, %v663_v13   ;;  %v350_v20 = vmul.f32 %v663_v13, %v349_v19 }
 0x18f   : > { %v361_v24 = vpop.permute.xlu2 %360 }
 0x190   : > { %v363_v25 = vmul.f32 %v361_v24, %v357_v23 }
 0x19e   : > { %v345_v15 = vpop.permute.xlu0 %344 }
 0x19f   : > { %v347_v16 = vsub.f32 %v331_v6, %v345_v15 }
 0x1a1   : > { %664 = vpow2.f32 %v347_v16 }
 0x1a7   : > { %v665_v17 = vpop.eup %664 }
 0x1a8   : > { %579 = vmatmul.msk.f32.vlgmr.msra.gmra.mxu1 %vm335_vm2, %v665_v17  ;;  %v351_v18 = vsel %vm335_vm2, %v665_v17, 0.0 }
 0x1a9   : > { %352 = vadd.xlane.f32.xlu1 %v351_v18 }
 0x21c   : > { %v353_v21 = vpop.xlane.xlu1 %352 }
 0x21d   : > { %v354_v22 = vadd.f32 %v353_v21, %v350_v20 }
 0x21f   : > { %356 = vst.msk [vmem:[#allocation4] sm:$0xff] %vm301_vm1, %v354_v22 }
 0x225   : > { %v385_v26 = vpop.f32.mrf.mxu1 }
 0x226   : > { %v388_v27 = vadd.f32 %v385_v26, %v363_v25  ;;  %v395_v28 = vld [vmem:[#allocation4] sm:$0xff] }
 0x227   : > { %398 = vperm.xlu1 %660, %v395_v28  }
 0x228   : > { %389 = vst.msk [vmem:[#allocation5] sm:$0xff] %vm299_vm0, %v388_v27 }
 0x22f   : > { %v394_v39 = vld [vmem:[#allocation5] sm:$0xff] }
 0x299   : > { %v399_v29 = vpop.permute.xlu1 %398 }
 0x29a   : > { %666 = vrcp.f32 %v399_v29  ;;  %v412_v33 = vand.u32 2147483648, %v399_v29  ;;  %v410_v35 = vand.u32 2147483647, %v399_v29  ;;  %vm406_vm4 = vweird.f32 %v399_v29 }
 0x29c   : > { %v413_v37 = vor.u32 1.1754944e-38, %v412_v33  ;;  %vm411_vm6 = vcmp.eq.f32.partialorder %v410_v35, 8.507059e+37 }
 0x2a0   : > { %v667_v30 = vpop.eup %666 }
 0x2a1   : > { %v402_v31 = vmul.f32 %v667_v30, %v399_v29  ;;  %vm407_vm3 = vweird.f32 %v667_v30 }
 0x2a2   : > { %vm408_vm5 = vmor %vm406_vm4, %vm407_vm3 }
 0x2a3   : > { %v403_v32 = vsub.f32 1.0, %v402_v31 }
 0x2a5   : > { %v404_v34 = vmul.f32 %v667_v30, %v403_v32 }
 0x2a7   : > { %v405_v36 = vadd.f32 %v667_v30, %v404_v34 }
 0x2a9   : > { %v409_v38 = vsel %vm408_vm5, %v667_v30, %v405_v36 }
 0x2aa   : > { %v414_v40 = vsel %vm411_vm6, %v413_v37, %v409_v38 }
 0x2ab   : > { %v415_v41 = vmul.f32 %v414_v40, %v394_v39 }
 0x2ad   : > { %416 = vst.msk [vmem:[%s292_s21] sm:$0xff] %vm299_vm0, %v415_v41 }
 0x2ae   : > { %785 = shalt.err (!%p782_p10)
}
 0x2af   : > { %590 = dma.vmem_to_hbm [thread:$0]  (%p924_p9), %s432_s23, 128, %s434_s6, %s418_s15  }
 0x2b0 PF: > { %p607_p12 = scmp.ge.s32.totalorder %s844_s17, 2  ;;  %s445_s22 = sand.u32 1, %s824_s12  }
 0x2b1   : > { %s446_s28 = scalar_lea.sflag [#allocation8], %s445_s22 }
 0x2b2   : > { %p603_p13 = pnand %p607_p12, %p931_p11 }
 0x2b4   : > { %p604_p0 = pneg %p603_p13 }
 0x2b6   : > { %819 = dma.done.wait (%p604_p0), %s446_s28, 128  }
 0x2b7   : > { %821 = vsyncadd (%p604_p0), %s446_s28, 4294967168  ;;  %s22_s17 = sadd.s32 1, %s844_s17   ;;  %s1055_s30 = sld [smem:[#allocation18_spill]] }
 0x2b8   : > { %p19_p1 = scmp.ge.s32.totalorder %s22_s17, 6   ;;  %s1056_s15 = sld [smem:[#allocation16_spill]] }
 0x2b9   : > { %s1057_s16 = sld [smem:[#allocation17_spill]]  ;;  %s1058_s12 = smov %s828_s13 }
 0x2ba   : > { %s1059_s13 = smov %s832_s14  ;;  %21 = sbr.rel (!%p19_p1) target bundleno = 10 (0xa), region = 109 }
 0x2bd   : > { %s1060_s14 = smov %s1055_s30 }
 0x2bf   :  { %452 = vsyncpa [#allocation7], 1 }
 0x2c0   :  { %454 = vsyncpa [#allocation7 + $0x1], 1 }
 0x2c1   :  { %455 = vsyncpa [#allocation10], 1 }
 0x2c2   :  { %457 = vsyncpa [#allocation10 + $0x1], 1 }
 0x2c3   :  { %458 = vsyncpa [#allocation8], 1 }
 0x2c4   :  { %460 = vsyncpa [#allocation8 + $0x1], 1 }

</bundles_post_ra>
